<compile_context>
chip_gen: v7x
topology: tpu7x:2x2x1
jax: 0.10.0
libtpu: 0.0.40
codegen_flags: <defaults>
</compile_context>

<pallas_src>
import math

import jax
import jax.numpy as jnp
from jax.experimental import pallas as pl
from jax.experimental.pallas import tpu as pltpu


def _pick_batch_tile(batch, num_nodes, target_rows=1024):
    """Largest divisor of `batch` whose row-block stays around `target_rows`
    rows and is sublane-friendly (multiple of 16 rows, or the full array)."""
    cands = []
    for bt in range(1, batch + 1):
        if batch % bt:
            continue
        rows = bt * num_nodes
        if rows > max(target_rows, num_nodes):
            continue
        if bt == batch or rows % 16 == 0:
            cands.append(bt)
    return max(cands) if cands else batch


def stgru_cell_pallas(x, h, lk, theta1, b1, theta2, b2,
                      *, matmul_dtype=jnp.float32,
                      batch_tile=None,
                      single_buffer_consts=True):
    """Pallas forward of STGRU_cell.

    x:(B,N,D_in)  h:(B,N,C)  lk:(N,N)  theta1:(D_in+C, 2C)  b1:(1,1,2C)
    theta2:(D_in+C, C)  b2:(1,1,C)   ->   new_state (B, N, C) float32.
    """
    B, N, D_in = x.shape
    C = h.shape[-1]
    F = D_in + C
    assert theta1.shape == (F, 2 * C)
    assert theta2.shape == (F, C)

    bt = batch_tile if batch_tile is not None else _pick_batch_tile(B, N)
    assert B % bt == 0
    num_bt = B // bt
    R = bt * N                      # rows per grid step
    mdt = matmul_dtype

    # ---- wrapper-side (XLA) preprocessing: once per call, outside the kernel.
    xh_rows = jnp.concatenate([x, h], axis=-1).reshape(B * N, F).astype(mdt)
    h_rows = h.reshape(B * N, C).astype(jnp.float32)
    lk_m = lk.astype(mdt)
    # fused weight: [theta1 | zero-padded x-rows of theta2]  -> (F, 3C).
    # (L@xh) @ [theta2_x ; 0] == (L@x) @ theta2_x exactly, so one MXU pass
    # yields both the gate pre-activation and the x-part of the candidate.
    t2x_pad = jnp.concatenate(
        [theta2[:D_in], jnp.zeros((C, C), theta2.dtype)], axis=0)
    w1 = jnp.concatenate([theta1, t2x_pad], axis=1).astype(mdt)      # (F, 3C)
    w2h = theta2[D_in:].astype(mdt)                                  # (C, C)
    b1_2d = b1.reshape(1, 2 * C).astype(jnp.float32)
    b2_2d = b2.reshape(1, C).astype(jnp.float32)

    def kernel(xh_ref, h_ref, lk_ref, w1_ref, w2h_ref, b1_ref, b2_ref,
               out_ref, lxh_ref, lrh_ref):
        def mm(a, b):
            # matmul operands in `mdt` (bf16 on v6e/v7x), accumulate in f32.
            return jnp.dot(a.astype(mdt), b.astype(mdt),
                           preferred_element_type=jnp.float32)

        lk_t = lk_ref[...]

        # Graph conv over concat([x, h]): Lk contracts the node axis, applied
        # per batch element of the tile; results assembled in VMEM scratch so
        # the fused theta matmul below sees all bt*N rows in one 2D matmul.
        for b in range(bt):
            rows = pl.ds(b * N, N)
            lxh_ref[rows, :] = mm(lk_t, xh_ref[rows, :])

        # One fused MXU pass: columns [0:2C] = gate pre-activation (theta1),
        # columns [2C:3C] = x-part of the candidate GCN (theta2 x-rows).
        big = mm(lxh_ref[...], w1_ref[...])                    # (R, 3C) f32
        pre1 = big[:, :2 * C]
        pre2_x = big[:, 2 * C:]

        # relu BEFORE the bias, matching spatio_conv_layer.forward.
        value = jax.nn.sigmoid(jnp.maximum(pre1, 0.0) + b1_ref[...])
        r = value[:, :C]
        u = value[:, C:]

        h_t = h_ref[...]
        rh = r * h_t

        # Graph conv over r*h for the candidate GCN (h-rows of theta2).
        for b in range(bt):
            rows = pl.ds(b * N, N)
            lrh_ref[rows, :] = mm(lk_t, rh[b * N:(b + 1) * N, :])

        pre2 = pre2_x + mm(lrh_ref[...], w2h_ref[...])
        c = jnp.tanh(jnp.maximum(pre2, 0.0) + b2_ref[...])

        out_ref[...] = u * h_t + (1.0 - u) * c

    def build(buffer_consts_once):
        const_kwargs = {}
        if buffer_consts_once:
            # Lk / weights / biases never change across the grid: single-buffer
            # them instead of the default double-buffer (VMEM discipline for
            # large N, esp. v7x's 64 MiB VMEM).
            const_kwargs = dict(pipeline_mode=pl.Buffered(1))

        def const_spec(shape):
            return pl.BlockSpec(shape, lambda i: (0,) * len(shape),
                                **const_kwargs)

        return pl.pallas_call(
            kernel,
            out_shape=jax.ShapeDtypeStruct((B * N, C), jnp.float32),
            grid=(num_bt,),
            in_specs=[
                pl.BlockSpec((R, F), lambda i: (i, 0)),        # xh rows
                pl.BlockSpec((R, C), lambda i: (i, 0)),        # h rows
                const_spec((N, N)),                            # Lk
                const_spec((F, 3 * C)),                        # fused theta
                const_spec((C, C)),                            # theta2 h-rows
                const_spec((1, 2 * C)),                        # b1
                const_spec((1, C)),                            # b2
            ],
            out_specs=pl.BlockSpec((R, C), lambda i: (i, 0)),
            scratch_shapes=[
                pltpu.VMEM((R, F), jnp.float32),               # L @ [x|h]
                pltpu.VMEM((R, C), jnp.float32),               # L @ (r*h)
            ],
            compiler_params=pltpu.CompilerParams(
                dimension_semantics=("parallel",)),
        )

    args = (xh_rows, h_rows, lk_m, w1, w2h, b1_2d, b2_2d)
    if single_buffer_consts:
        try:
            out = build(True)(*args)
            return out.reshape(B, N, C)
        except Exception:
            # Fallback for Pallas versions without BlockSpec(pipeline_mode=...).
            pass
    out = build(False)(*args)
    return out.reshape(B, N, C)


def stgru_cell_ref(x, h, lk, theta1, b1, theta2, b2):
    """Pure-JAX reference mirroring the PyTorch forward exactly."""
    C = h.shape[-1]

    def spatio_conv(inp, state, theta, b):
        xs = jnp.concatenate([inp, state], axis=2)              # (B, N, F)
        # torch.einsum('ij,jkl->kil', Lk, xs.permute(1,0,2))
        lfs = jnp.einsum('ij,jkl->kil', lk, jnp.transpose(xs, (1, 0, 2)))
        return jnp.maximum(jnp.matmul(lfs, theta), 0.0) + b

    value = jax.nn.sigmoid(spatio_conv(x, h, theta1, b1))
    r, u = value[..., :C], value[..., C:]
    c = jnp.tanh(spatio_conv(x, r * h, theta2, b2))
    return u * h + (1.0 - u) * c


if __name__ == "__main__":
    # small shapes consistent with the module: c_in = D_in + c_out
    B, N, D_in, C = 2, 16, 4, 32
    c_in = D_in + C

    key = jax.random.PRNGKey(0)
    ks = jax.random.split(key, 8)

    x = jax.random.normal(ks[0], (B, N, D_in), dtype=jnp.float32)
    h = jax.random.normal(ks[1], (B, N, C), dtype=jnp.float32)
    # symmetric-normalized-ish random graph operator, deterministic
    a = jax.random.uniform(ks[2], (N, N), dtype=jnp.float32)
    lk = (a + a.T) / (2.0 * N)

    # kaiming_uniform_(a=sqrt(5)) on a 2D tensor -> U(-1/sqrt(fan_in), +)
    bnd1 = 1.0 / math.sqrt(2 * C)
    theta1 = jax.random.uniform(ks[3], (c_in, 2 * C), jnp.float32, -bnd1, bnd1)
    b1 = jax.random.uniform(ks[4], (1, 1, 2 * C), jnp.float32, -bnd1, bnd1)
    bnd2 = 1.0 / math.sqrt(C)
    theta2 = jax.random.uniform(ks[5], (c_in, C), jnp.float32, -bnd2, bnd2)
    b2 = jax.random.uniform(ks[6], (1, 1, C), jnp.float32, -bnd2, bnd2)

    ref = stgru_cell_ref(x, h, lk, theta1, b1, theta2, b2)

    # exact path: f32 matmul operands
    out = stgru_cell_pallas(x, h, lk, theta1, b1, theta2, b2)
    out = jax.block_until_ready(out)
    assert out.shape == (B, N, C)
    assert jnp.allclose(out, ref, atol=1e-4, rtol=1e-4), "f32 mismatch vs ref"

    # reduced-precision matmul path (bf16 operands, f32 accumulation) targeting
    # v6e / v7x MXUs; element-wise math stays f32, tolerance relaxed for bf16.
    out_bf16 = stgru_cell_pallas(x, h, lk, theta1, b1, theta2, b2,
                                 matmul_dtype=jnp.bfloat16)
    out_bf16 = jax.block_until_ready(out_bf16)
    assert out_bf16.shape == (B, N, C)
    assert jnp.allclose(out_bf16, ref, atol=5e-2, rtol=5e-2), "bf16 mismatch"

    print("KERNEL_OK")
</pallas_src>

<mosaic_0001>
module attributes {stable_mosaic.version = 11 : i64} {
  func.func @kernel(%arg0: i32, %arg1: memref<32x36xf32, #tpu.memory_space<vmem>>, %arg2: memref<32x32xf32, #tpu.memory_space<vmem>>, %arg3: memref<16x16xf32, #tpu.memory_space<vmem>>, %arg4: memref<36x96xf32, #tpu.memory_space<vmem>>, %arg5: memref<32x32xf32, #tpu.memory_space<vmem>>, %arg6: memref<1x64xf32, #tpu.memory_space<vmem>>, %arg7: memref<1x32xf32, #tpu.memory_space<vmem>>, %arg8: memref<32x32xf32, #tpu.memory_space<vmem>>, %arg9: memref<32x36xf32, #tpu.memory_space<vmem>>, %arg10: memref<32x32xf32, #tpu.memory_space<vmem>>) attributes {dimension_semantics = [#tpu.dimension_semantics<parallel>], iteration_bounds = array<i64: 1>, scalar_prefetch = 0 : i64, scratch_operands = 2 : i64, tpu.core_type = #tpu.core_type<tc>, window_params = [{transform_indices = @transform_0, window_bounds = array<i64: 32, 36>}, {transform_indices = @transform_1, window_bounds = array<i64: 32, 32>}, {pipeline_mode = #tpu.pipeline_mode<synchronous>, transform_indices = @transform_2, window_bounds = array<i64: 16, 16>}, {pipeline_mode = #tpu.pipeline_mode<synchronous>, transform_indices = @transform_3, window_bounds = array<i64: 36, 96>}, {pipeline_mode = #tpu.pipeline_mode<synchronous>, transform_indices = @transform_4, window_bounds = array<i64: 32, 32>}, {pipeline_mode = #tpu.pipeline_mode<synchronous>, transform_indices = @transform_5, window_bounds = array<i64: 1, 64>}, {pipeline_mode = #tpu.pipeline_mode<synchronous>, transform_indices = @transform_6, window_bounds = array<i64: 1, 32>}, {transform_indices = @transform_7, window_bounds = array<i64: 32, 32>}]} {
    %c0 = arith.constant 0 : index
    %c0_0 = arith.constant 0 : index
    %0 = vector.load %arg3[%c0, %c0_0] : memref<16x16xf32, #tpu.memory_space<vmem>>, vector<16x16xf32>
    %c0_1 = arith.constant 0 : index
    %c0_2 = arith.constant 0 : index
    %1 = vector.load %arg1[%c0_1, %c0_2] : memref<32x36xf32, #tpu.memory_space<vmem>>, vector<16x36xf32>
    %cst = arith.constant dense<0.000000e+00> : vector<16x36xf32>
    %2 = tpu.matmul %0, %1, %cst {dimension_numbers = #tpu.dot_dimension_numbers<[1], [0], [0], [1], [0, 0, 1, 1], [], []>} : vector<16x16xf32>, vector<16x36xf32>, vector<16x36xf32> -> vector<16x36xf32>
    %c0_3 = arith.constant 0 : index
    %c0_4 = arith.constant 0 : index
    %3 = vector.load %arg9[%c0_3, %c0_4] : memref<32x36xf32, #tpu.memory_space<vmem>>, vector<16x36xf32>
    tpu.vector_store %arg9[%c0_3, %c0_4], %2 {strides = array<i32>} : memref<32x36xf32, #tpu.memory_space<vmem>>, vector<16x36xf32>,
    %c16 = arith.constant 16 : index
    %c0_5 = arith.constant 0 : index
    %4 = vector.load %arg1[%c16, %c0_5] : memref<32x36xf32, #tpu.memory_space<vmem>>, vector<16x36xf32>
    %cst_6 = arith.constant dense<0.000000e+00> : vector<16x36xf32>
    %5 = tpu.matmul %0, %4, %cst_6 {dimension_numbers = #tpu.dot_dimension_numbers<[1], [0], [0], [1], [0, 0, 1, 1], [], []>} : vector<16x16xf32>, vector<16x36xf32>, vector<16x36xf32> -> vector<16x36xf32>
    %c16_7 = arith.constant 16 : index
    %c0_8 = arith.constant 0 : index
    %6 = vector.load %arg9[%c16_7, %c0_8] : memref<32x36xf32, #tpu.memory_space<vmem>>, vector<16x36xf32>
    tpu.vector_store %arg9[%c16_7, %c0_8], %5 {strides = array<i32>} : memref<32x36xf32, #tpu.memory_space<vmem>>, vector<16x36xf32>,
    %c0_9 = arith.constant 0 : index
    %c0_10 = arith.constant 0 : index
    %7 = vector.load %arg9[%c0_9, %c0_10] : memref<32x36xf32, #tpu.memory_space<vmem>>, vector<32x36xf32>
    %c0_11 = arith.constant 0 : index
    %c0_12 = arith.constant 0 : index
    %8 = vector.load %arg4[%c0_11, %c0_12] : memref<36x96xf32, #tpu.memory_space<vmem>>, vector<36x96xf32>
    %cst_13 = arith.constant dense<0.000000e+00> : vector<32x96xf32>
    %9 = tpu.matmul %7, %8, %cst_13 {dimension_numbers = #tpu.dot_dimension_numbers<[1], [0], [0], [1], [0, 0, 1, 1], [], []>} : vector<32x36xf32>, vector<36x96xf32>, vector<32x96xf32> -> vector<32x96xf32>
    %10 = vector.extract_strided_slice %9 {offsets = [0, 0], sizes = [32, 64], strides = [1, 1]} : vector<32x96xf32> to vector<32x64xf32>
    %11 = vector.extract_strided_slice %9 {offsets = [0, 64], sizes = [32, 32], strides = [1, 1]} : vector<32x96xf32> to vector<32x32xf32>
    %cst_14 = arith.constant 0.000000e+00 : f32
    %12 = vector.broadcast %cst_14 : f32 to vector<32x64xf32>
    %13 = arith.maximumf %10, %12 : vector<32x64xf32>
    %c0_15 = arith.constant 0 : index
    %c0_16 = arith.constant 0 : index
    %14 = vector.load %arg6[%c0_15, %c0_16] : memref<1x64xf32, #tpu.memory_space<vmem>>, vector<1x64xf32>
    %15 = vector.broadcast %14 : vector<1x64xf32> to vector<32x64xf32>
    %16 = arith.addf %13, %15 : vector<32x64xf32>
    %17 = arith.negf %16 : vector<32x64xf32>
    %18 = math.exp %17 : vector<32x64xf32>
    %cst_17 = arith.constant 1.000000e+00 : f32
    %19 = vector.broadcast %cst_17 : f32 to vector<32x64xf32>
    %20 = arith.addf %19, %18 : vector<32x64xf32>
    %21 = arith.divf %19, %20 : vector<32x64xf32>
    %22 = vector.extract_strided_slice %21 {offsets = [0, 0], sizes = [32, 32], strides = [1, 1]} : vector<32x64xf32> to vector<32x32xf32>
    %23 = vector.extract_strided_slice %21 {offsets = [0, 32], sizes = [32, 32], strides = [1, 1]} : vector<32x64xf32> to vector<32x32xf32>
    %c0_18 = arith.constant 0 : index
    %c0_19 = arith.constant 0 : index
    %24 = vector.load %arg2[%c0_18, %c0_19] : memref<32x32xf32, #tpu.memory_space<vmem>>, vector<32x32xf32>
    %25 = arith.mulf %22, %24 : vector<32x32xf32>
    %26 = vector.extract_strided_slice %25 {offsets = [0, 0], sizes = [16, 32], strides = [1, 1]} : vector<32x32xf32> to vector<16x32xf32>
    %cst_20 = arith.constant dense<0.000000e+00> : vector<16x32xf32>
    %27 = tpu.matmul %0, %26, %cst_20 {dimension_numbers = #tpu.dot_dimension_numbers<[1], [0], [0], [1], [0, 0, 1, 1], [], []>} : vector<16x16xf32>, vector<16x32xf32>, vector<16x32xf32> -> vector<16x32xf32>
    %c0_21 = arith.constant 0 : index
    %c0_22 = arith.constant 0 : index
    %28 = vector.load %arg10[%c0_21, %c0_22] : memref<32x32xf32, #tpu.memory_space<vmem>>, vector<16x32xf32>
    tpu.vector_store %arg10[%c0_21, %c0_22], %27 {strides = array<i32>} : memref<32x32xf32, #tpu.memory_space<vmem>>, vector<16x32xf32>,
    %29 = vector.extract_strided_slice %25 {offsets = [16, 0], sizes = [16, 32], strides = [1, 1]} : vector<32x32xf32> to vector<16x32xf32>
    %cst_23 = arith.constant dense<0.000000e+00> : vector<16x32xf32>
    %30 = tpu.matmul %0, %29, %cst_23 {dimension_numbers = #tpu.dot_dimension_numbers<[1], [0], [0], [1], [0, 0, 1, 1], [], []>} : vector<16x16xf32>, vector<16x32xf32>, vector<16x32xf32> -> vector<16x32xf32>
    %c16_24 = arith.constant 16 : index
    %c0_25 = arith.constant 0 : index
    %31 = vector.load %arg10[%c16_24, %c0_25] : memref<32x32xf32, #tpu.memory_space<vmem>>, vector<16x32xf32>
    tpu.vector_store %arg10[%c16_24, %c0_25], %30 {strides = array<i32>} : memref<32x32xf32, #tpu.memory_space<vmem>>, vector<16x32xf32>,
    %c0_26 = arith.constant 0 : index
    %c0_27 = arith.constant 0 : index
    %32 = vector.load %arg10[%c0_26, %c0_27] : memref<32x32xf32, #tpu.memory_space<vmem>>, vector<32x32xf32>
    %c0_28 = arith.constant 0 : index
    %c0_29 = arith.constant 0 : index
    %33 = vector.load %arg5[%c0_28, %c0_29] : memref<32x32xf32, #tpu.memory_space<vmem>>, vector<32x32xf32>
    %cst_30 = arith.constant dense<0.000000e+00> : vector<32x32xf32>
    %34 = tpu.matmul %32, %33, %cst_30 {dimension_numbers = #tpu.dot_dimension_numbers<[1], [0], [0], [1], [0, 0, 1, 1], [], []>} : vector<32x32xf32>, vector<32x32xf32>, vector<32x32xf32> -> vector<32x32xf32>
    %35 = arith.addf %11, %34 : vector<32x32xf32>
    %cst_31 = arith.constant 0.000000e+00 : f32
    %36 = vector.broadcast %cst_31 : f32 to vector<32x32xf32>
    %37 = arith.maximumf %35, %36 : vector<32x32xf32>
    %c0_32 = arith.constant 0 : index
    %c0_33 = arith.constant 0 : index
    %38 = vector.load %arg7[%c0_32, %c0_33] : memref<1x32xf32, #tpu.memory_space<vmem>>, vector<1x32xf32>
    %39 = vector.broadcast %38 : vector<1x32xf32> to vector<32x32xf32>
    %40 = arith.addf %37, %39 : vector<32x32xf32>
    %41 = math.tanh %40 : vector<32x32xf32>
    %42 = arith.mulf %23, %24 : vector<32x32xf32>
    %cst_34 = arith.constant 1.000000e+00 : f32
    %43 = vector.broadcast %cst_34 : f32 to vector<32x32xf32>
    %44 = arith.subf %43, %23 : vector<32x32xf32>
    %45 = arith.mulf %44, %41 : vector<32x32xf32>
    %46 = arith.addf %42, %45 : vector<32x32xf32>
    %c0_35 = arith.constant 0 : index
    %c0_36 = arith.constant 0 : index
    %47 = vector.load %arg8[%c0_35, %c0_36] : memref<32x32xf32, #tpu.memory_space<vmem>>, vector<32x32xf32>
    tpu.vector_store %arg8[%c0_35, %c0_36], %46 {strides = array<i32>} : memref<32x32xf32, #tpu.memory_space<vmem>>, vector<32x32xf32>,
    return
  }
  func.func @transform_0(%arg0: i32) -> (i32, i32) {
    %c0_i32 = arith.constant 0 : i32
    %c0_i32_0 = arith.constant 0 : i32
    return %arg0, %c0_i32 : i32, i32
  }
  func.func @transform_1(%arg0: i32) -> (i32, i32) {
    %c0_i32 = arith.constant 0 : i32
    %c0_i32_0 = arith.constant 0 : i32
    return %arg0, %c0_i32 : i32, i32
  }
  func.func @transform_2(%arg0: i32) -> (i32, i32) {
    %c0_i32 = arith.constant 0 : i32
    %c0_i32_0 = arith.constant 0 : i32
    %c0_i32_1 = arith.constant 0 : i32
    return %c0_i32, %c0_i32_0 : i32, i32
  }
  func.func @transform_3(%arg0: i32) -> (i32, i32) {
    %c0_i32 = arith.constant 0 : i32
    %c0_i32_0 = arith.constant 0 : i32
    %c0_i32_1 = arith.constant 0 : i32
    return %c0_i32, %c0_i32_0 : i32, i32
  }
  func.func @transform_4(%arg0: i32) -> (i32, i32) {
    %c0_i32 = arith.constant 0 : i32
    %c0_i32_0 = arith.constant 0 : i32
    %c0_i32_1 = arith.constant 0 : i32
    return %c0_i32, %c0_i32_0 : i32, i32
  }
  func.func @transform_5(%arg0: i32) -> (i32, i32) {
    %c0_i32 = arith.constant 0 : i32
    %c0_i32_0 = arith.constant 0 : i32
    %c0_i32_1 = arith.constant 0 : i32
    return %c0_i32, %c0_i32_0 : i32, i32
  }
  func.func @transform_6(%arg0: i32) -> (i32, i32) {
    %c0_i32 = arith.constant 0 : i32
    %c0_i32_0 = arith.constant 0 : i32
    %c0_i32_1 = arith.constant 0 : i32
    return %c0_i32, %c0_i32_0 : i32, i32
  }
  func.func @transform_7(%arg0: i32) -> (i32, i32) {
    %c0_i32 = arith.constant 0 : i32
    %c0_i32_0 = arith.constant 0 : i32
    return %arg0, %c0_i32 : i32, i32
  }
}

module attributes {stable_mosaic.version = 11 : i64} {
  func.func @kernel(%arg0: i32, %arg1: memref<32x36xf32, #tpu.memory_space<vmem>>, %arg2: memref<32x32xf32, #tpu.memory_space<vmem>>, %arg3: memref<16x16xf32, #tpu.memory_space<vmem>>, %arg4: memref<36x96xf32, #tpu.memory_space<vmem>>, %arg5: memref<32x32xf32, #tpu.memory_space<vmem>>, %arg6: memref<1x64xf32, #tpu.memory_space<vmem>>, %arg7: memref<1x32xf32, #tpu.memory_space<vmem>>, %arg8: memref<32x32xf32, #tpu.memory_space<vmem>>, %arg9: memref<32x36xf32, #tpu.memory_space<vmem>>, %arg10: memref<32x32xf32, #tpu.memory_space<vmem>>) attributes {dimension_semantics = [#tpu.dimension_semantics<parallel>], iteration_bounds = array<i64: 1>, scalar_prefetch = 0 : i64, scratch_operands = 2 : i64, tpu.core_type = #tpu.core_type<tc>, window_params = [{transform_indices = @transform_0, window_bounds = array<i64: 32, 36>}, {transform_indices = @transform_1, window_bounds = array<i64: 32, 32>}, {pipeline_mode = #tpu.pipeline_mode<synchronous>, transform_indices = @transform_2, window_bounds = array<i64: 16, 16>}, {pipeline_mode = #tpu.pipeline_mode<synchronous>, transform_indices = @transform_3, window_bounds = array<i64: 36, 96>}, {pipeline_mode = #tpu.pipeline_mode<synchronous>, transform_indices = @transform_4, window_bounds = array<i64: 32, 32>}, {pipeline_mode = #tpu.pipeline_mode<synchronous>, transform_indices = @transform_5, window_bounds = array<i64: 1, 64>}, {pipeline_mode = #tpu.pipeline_mode<synchronous>, transform_indices = @transform_6, window_bounds = array<i64: 1, 32>}, {transform_indices = @transform_7, window_bounds = array<i64: 32, 32>}]} {
    %c0 = arith.constant 0 : index
    %c0_0 = arith.constant 0 : index
    %0 = vector.load %arg3[%c0, %c0_0] : memref<16x16xf32, #tpu.memory_space<vmem>>, vector<16x16xf32>
    %c0_1 = arith.constant 0 : index
    %c0_2 = arith.constant 0 : index
    %1 = vector.load %arg1[%c0_1, %c0_2] : memref<32x36xf32, #tpu.memory_space<vmem>>, vector<16x36xf32>
    %cst = arith.constant dense<0.000000e+00> : vector<16x36xf32>
    %2 = tpu.matmul %0, %1, %cst {dimension_numbers = #tpu.dot_dimension_numbers<[1], [0], [0], [1], [0, 0, 1, 1], [], []>} : vector<16x16xf32>, vector<16x36xf32>, vector<16x36xf32> -> vector<16x36xf32>
    %c0_3 = arith.constant 0 : index
    %c0_4 = arith.constant 0 : index
    %3 = vector.load %arg9[%c0_3, %c0_4] : memref<32x36xf32, #tpu.memory_space<vmem>>, vector<16x36xf32>
    tpu.vector_store %arg9[%c0_3, %c0_4], %2 {strides = array<i32>} : memref<32x36xf32, #tpu.memory_space<vmem>>, vector<16x36xf32>,
    %c16 = arith.constant 16 : index
    %c0_5 = arith.constant 0 : index
    %4 = vector.load %arg1[%c16, %c0_5] : memref<32x36xf32, #tpu.memory_space<vmem>>, vector<16x36xf32>
    %cst_6 = arith.constant dense<0.000000e+00> : vector<16x36xf32>
    %5 = tpu.matmul %0, %4, %cst_6 {dimension_numbers = #tpu.dot_dimension_numbers<[1], [0], [0], [1], [0, 0, 1, 1], [], []>} : vector<16x16xf32>, vector<16x36xf32>, vector<16x36xf32> -> vector<16x36xf32>
    %c16_7 = arith.constant 16 : index
    %c0_8 = arith.constant 0 : index
    %6 = vector.load %arg9[%c16_7, %c0_8] : memref<32x36xf32, #tpu.memory_space<vmem>>, vector<16x36xf32>
    tpu.vector_store %arg9[%c16_7, %c0_8], %5 {strides = array<i32>} : memref<32x36xf32, #tpu.memory_space<vmem>>, vector<16x36xf32>,
    %c0_9 = arith.constant 0 : index
    %c0_10 = arith.constant 0 : index
    %7 = vector.load %arg9[%c0_9, %c0_10] : memref<32x36xf32, #tpu.memory_space<vmem>>, vector<32x36xf32>
    %c0_11 = arith.constant 0 : index
    %c0_12 = arith.constant 0 : index
    %8 = vector.load %arg4[%c0_11, %c0_12] : memref<36x96xf32, #tpu.memory_space<vmem>>, vector<36x96xf32>
    %cst_13 = arith.constant dense<0.000000e+00> : vector<32x96xf32>
    %9 = tpu.matmul %7, %8, %cst_13 {dimension_numbers = #tpu.dot_dimension_numbers<[1], [0], [0], [1], [0, 0, 1, 1], [], []>} : vector<32x36xf32>, vector<36x96xf32>, vector<32x96xf32> -> vector<32x96xf32>
    %10 = vector.extract_strided_slice %9 {offsets = [0, 0], sizes = [32, 64], strides = [1, 1]} : vector<32x96xf32> to vector<32x64xf32>
    %11 = vector.extract_strided_slice %9 {offsets = [0, 64], sizes = [32, 32], strides = [1, 1]} : vector<32x96xf32> to vector<32x32xf32>
    %cst_14 = arith.constant 0.000000e+00 : f32
    %12 = vector.broadcast %cst_14 : f32 to vector<32x64xf32>
    %13 = arith.maximumf %10, %12 : vector<32x64xf32>
    %c0_15 = arith.constant 0 : index
    %c0_16 = arith.constant 0 : index
    %14 = vector.load %arg6[%c0_15, %c0_16] : memref<1x64xf32, #tpu.memory_space<vmem>>, vector<1x64xf32>
    %15 = vector.broadcast %14 : vector<1x64xf32> to vector<32x64xf32>
    %16 = arith.addf %13, %15 : vector<32x64xf32>
    %17 = arith.negf %16 : vector<32x64xf32>
    %18 = math.exp %17 : vector<32x64xf32>
    %cst_17 = arith.constant 1.000000e+00 : f32
    %19 = vector.broadcast %cst_17 : f32 to vector<32x64xf32>
    %20 = arith.addf %19, %18 : vector<32x64xf32>
    %21 = arith.divf %19, %20 : vector<32x64xf32>
    %22 = vector.extract_strided_slice %21 {offsets = [0, 0], sizes = [32, 32], strides = [1, 1]} : vector<32x64xf32> to vector<32x32xf32>
    %23 = vector.extract_strided_slice %21 {offsets = [0, 32], sizes = [32, 32], strides = [1, 1]} : vector<32x64xf32> to vector<32x32xf32>
    %c0_18 = arith.constant 0 : index
    %c0_19 = arith.constant 0 : index
    %24 = vector.load %arg2[%c0_18, %c0_19] : memref<32x32xf32, #tpu.memory_space<vmem>>, vector<32x32xf32>
    %25 = arith.mulf %22, %24 : vector<32x32xf32>
    %26 = vector.extract_strided_slice %25 {offsets = [0, 0], sizes = [16, 32], strides = [1, 1]} : vector<32x32xf32> to vector<16x32xf32>
    %cst_20 = arith.constant dense<0.000000e+00> : vector<16x32xf32>
    %27 = tpu.matmul %0, %26, %cst_20 {dimension_numbers = #tpu.dot_dimension_numbers<[1], [0], [0], [1], [0, 0, 1, 1], [], []>} : vector<16x16xf32>, vector<16x32xf32>, vector<16x32xf32> -> vector<16x32xf32>
    %c0_21 = arith.constant 0 : index
    %c0_22 = arith.constant 0 : index
    %28 = vector.load %arg10[%c0_21, %c0_22] : memref<32x32xf32, #tpu.memory_space<vmem>>, vector<16x32xf32>
    tpu.vector_store %arg10[%c0_21, %c0_22], %27 {strides = array<i32>} : memref<32x32xf32, #tpu.memory_space<vmem>>, vector<16x32xf32>,
    %29 = vector.extract_strided_slice %25 {offsets = [16, 0], sizes = [16, 32], strides = [1, 1]} : vector<32x32xf32> to vector<16x32xf32>
    %cst_23 = arith.constant dense<0.000000e+00> : vector<16x32xf32>
    %30 = tpu.matmul %0, %29, %cst_23 {dimension_numbers = #tpu.dot_dimension_numbers<[1], [0], [0], [1], [0, 0, 1, 1], [], []>} : vector<16x16xf32>, vector<16x32xf32>, vector<16x32xf32> -> vector<16x32xf32>
    %c16_24 = arith.constant 16 : index
    %c0_25 = arith.constant 0 : index
    %31 = vector.load %arg10[%c16_24, %c0_25] : memref<32x32xf32, #tpu.memory_space<vmem>>, vector<16x32xf32>
    tpu.vector_store %arg10[%c16_24, %c0_25], %30 {strides = array<i32>} : memref<32x32xf32, #tpu.memory_space<vmem>>, vector<16x32xf32>,
    %c0_26 = arith.constant 0 : index
    %c0_27 = arith.constant 0 : index
    %32 = vector.load %arg10[%c0_26, %c0_27] : memref<32x32xf32, #tpu.memory_space<vmem>>, vector<32x32xf32>
    %c0_28 = arith.constant 0 : index
    %c0_29 = arith.constant 0 : index
    %33 = vector.load %arg5[%c0_28, %c0_29] : memref<32x32xf32, #tpu.memory_space<vmem>>, vector<32x32xf32>
    %cst_30 = arith.constant dense<0.000000e+00> : vector<32x32xf32>
    %34 = tpu.matmul %32, %33, %cst_30 {dimension_numbers = #tpu.dot_dimension_numbers<[1], [0], [0], [1], [0, 0, 1, 1], [], []>} : vector<32x32xf32>, vector<32x32xf32>, vector<32x32xf32> -> vector<32x32xf32>
    %35 = arith.addf %11, %34 : vector<32x32xf32>
    %cst_31 = arith.constant 0.000000e+00 : f32
    %36 = vector.broadcast %cst_31 : f32 to vector<32x32xf32>
    %37 = arith.maximumf %35, %36 : vector<32x32xf32>
    %c0_32 = arith.constant 0 : index
    %c0_33 = arith.constant 0 : index
    %38 = vector.load %arg7[%c0_32, %c0_33] : memref<1x32xf32, #tpu.memory_space<vmem>>, vector<1x32xf32>
    %39 = vector.broadcast %38 : vector<1x32xf32> to vector<32x32xf32>
    %40 = arith.addf %37, %39 : vector<32x32xf32>
    %41 = math.tanh %40 : vector<32x32xf32>
    %42 = arith.mulf %23, %24 : vector<32x32xf32>
    %cst_34 = arith.constant 1.000000e+00 : f32
    %43 = vector.broadcast %cst_34 : f32 to vector<32x32xf32>
    %44 = arith.subf %43, %23 : vector<32x32xf32>
    %45 = arith.mulf %44, %41 : vector<32x32xf32>
    %46 = arith.addf %42, %45 : vector<32x32xf32>
    %c0_35 = arith.constant 0 : index
    %c0_36 = arith.constant 0 : index
    %47 = vector.load %arg8[%c0_35, %c0_36] : memref<32x32xf32, #tpu.memory_space<vmem>>, vector<32x32xf32>
    tpu.vector_store %arg8[%c0_35, %c0_36], %46 {strides = array<i32>} : memref<32x32xf32, #tpu.memory_space<vmem>>, vector<32x32xf32>,
    return
  }
  func.func @transform_0(%arg0: i32) -> (i32, i32) {
    %c0_i32 = arith.constant 0 : i32
    %c0_i32_0 = arith.constant 0 : i32
    return %arg0, %c0_i32 : i32, i32
  }
  func.func @transform_1(%arg0: i32) -> (i32, i32) {
    %c0_i32 = arith.constant 0 : i32
    %c0_i32_0 = arith.constant 0 : i32
    return %arg0, %c0_i32 : i32, i32
  }
  func.func @transform_2(%arg0: i32) -> (i32, i32) {
    %c0_i32 = arith.constant 0 : i32
    %c0_i32_0 = arith.constant 0 : i32
    %c0_i32_1 = arith.constant 0 : i32
    return %c0_i32, %c0_i32_0 : i32, i32
  }
  func.func @transform_3(%arg0: i32) -> (i32, i32) {
    %c0_i32 = arith.constant 0 : i32
    %c0_i32_0 = arith.constant 0 : i32
    %c0_i32_1 = arith.constant 0 : i32
    return %c0_i32, %c0_i32_0 : i32, i32
  }
  func.func @transform_4(%arg0: i32) -> (i32, i32) {
    %c0_i32 = arith.constant 0 : i32
    %c0_i32_0 = arith.constant 0 : i32
    %c0_i32_1 = arith.constant 0 : i32
    return %c0_i32, %c0_i32_0 : i32, i32
  }
  func.func @transform_5(%arg0: i32) -> (i32, i32) {
    %c0_i32 = arith.constant 0 : i32
    %c0_i32_0 = arith.constant 0 : i32
    %c0_i32_1 = arith.constant 0 : i32
    return %c0_i32, %c0_i32_0 : i32, i32
  }
  func.func @transform_6(%arg0: i32) -> (i32, i32) {
    %c0_i32 = arith.constant 0 : i32
    %c0_i32_0 = arith.constant 0 : i32
    %c0_i32_1 = arith.constant 0 : i32
    return %c0_i32, %c0_i32_0 : i32, i32
  }
  func.func @transform_7(%arg0: i32) -> (i32, i32) {
    %c0_i32 = arith.constant 0 : i32
    %c0_i32_0 = arith.constant 0 : i32
    return %arg0, %c0_i32 : i32, i32
  }
}

</mosaic_0001>

<bundles_post_ra>
// kernel: tpu_custom_call.1
= control target key start
LH: loop header
LB: loop body
LE: loop exit
PB: predicated region body
PF: predicated region fallthrough
CT: control target
= control target key end

     0   :  { %12 = vsyncpa [#allocation5], 0  ;;  %s1374_s0 = inlined_call_operand.hbm [shape: f32[32,36], index: 0, kind: input, shape index: {}]   ;;  %s1375_s1 = inlined_call_operand.hbm [shape: f32[32,32], index: 1, kind: input, shape index: {}]   ;;  %s1376_s2 = inlined_call_operand.hbm [shape: f32[16,16], index: 2, kind: input, shape index: {}]   ;;  %s1377_s3 = inlined_call_operand.hbm [shape: f32[36,96], index: 3, kind: input, shape index: {}]   ;;  %s1378_s4 = inlined_call_operand.hbm [shape: f32[32,32], index: 4, kind: input, shape index: {}]   ;;  %s1379_s5 = inlined_call_operand.vmem [shape: f32[1,64], index: 5, kind: input, shape index: {}]   ;;  %s1380_s6 = inlined_call_operand.vmem [shape: f32[1,32], index: 6, kind: input, shape index: {}]   ;;  %s1381_s7 = inlined_call_operand.hbm [shape: f32[32,32], index: 7, kind: output, shape index: {}]  }
   0x1   :  { %13 = vsyncpa [#allocation8], 0 }
   0x2   :  { %14 = vsyncpa [#allocation11], 0 }
   0x3   :  { %15 = vsyncpa [#allocation6], 0  ;;  %s1129_s24 = smov [#allocation7]   ;;  %s1130_s26 = smov [#allocation10]  }
   0x4   :  { %s33_s25 = sshll.u32 %s1129_s24, 4  ;;  %s57_s27 = sshll.u32 %s1130_s26, 4  ;;  %s34_s25 = int_to_ptr.vmem [resolvable:$true] %s33_s25  ;;  %s1180_s27 = int_to_ptr.vmem [resolvable:$true] %s57_s27 }
   0x5   :  { %s989_s30 = scalar_lea.hbm %s1375_s1, 512 }
   0x6   :  { %p990_p0 = scmp.ne.s32.totalorder %s1375_s1, %s989_s30  ;;  %p993_p1 = scmp.lt.u32.totalorder %s989_s30, %s1375_s1 }
   0x8   :  { %p995_p2 = pnand %p993_p1, %p990_p0 }
   0xa   :  { %998 = shalt.err (!%p995_p2)
}
   0xb   :  { %s999_s12 = scalar_lea.vmem %s34_s25, 512  ;;  %p1004_p4 = scmp.lt.s32.totalorder %s34_s25, %s34_s25 }
   0xc   :  { %p1000_p3 = scmp.ne.s32.totalorder %s34_s25, %s999_s12  ;;  %p1005_p5 = scmp.lt.s32.totalorder %s999_s12, %s999_s12 }
   0xe   :  { %p1006_p6 = por %p1005_p5, %p1004_p4 }
  0x10   :  { %p1007_p7 = pnand %p1006_p6, %p1000_p3 }
  0x12   :  { %1010 = shalt.err (!%p1007_p7)
}
  0x13   :  { %s1131_s13 = smov 128   ;;  %s1132_s14 = smov 8  }
  0x14   :  { %39 = dma.hbm_to_vmem [thread:$0]  %s1375_s1, 512, %s34_s25, [#allocation8], %s1131_s13, %s1131_s13, %s1132_s14  }
  0x15   :  { %s1011_s19 = scalar_lea.hbm %s1377_s3, 640 }
  0x16   :  { %p1012_p8 = scmp.ne.s32.totalorder %s1377_s3, %s1011_s19  ;;  %p1015_p9 = scmp.lt.u32.totalorder %s1011_s19, %s1377_s3 }
  0x18   :  { %p1017_p10 = pnand %p1015_p9, %p1012_p8 }
  0x1a   :  { %1020 = shalt.err (!%p1017_p10)
}
  0x1b   :  { %s1021_s24 = scalar_lea.vmem %s1180_s27, 640  ;;  %p1026_p12 = scmp.lt.s32.totalorder %s1180_s27, %s1180_s27 }
  0x1c   :  { %p1022_p11 = scmp.ne.s32.totalorder %s1180_s27, %s1021_s24  ;;  %p1027_p13 = scmp.lt.s32.totalorder %s1021_s24, %s1021_s24 }
  0x1e   :  { %p1028_p0 = por %p1027_p13, %p1026_p12 }
  0x20   :  { %p1029_p1 = pnand %p1028_p0, %p1022_p11 }
  0x22   :  { %1032 = shalt.err (!%p1029_p1)
}
  0x23   :  { %63 = dma.hbm_to_vmem [thread:$0]  %s1377_s3, 640, %s1180_s27, [#allocation11], %s1131_s13, %s1131_s13, %s1132_s14  }
  0x24   :  { %s1133_s26 = smov [#allocation4]   ;;  %s1134_s29 = smov [#allocation9]  }
  0x25   :  { %s21_s28 = sshll.u32 %s1133_s26, 4  ;;  %s45_s30 = sshll.u32 %s1134_s29, 4  ;;  %s22_s28 = int_to_ptr.vmem [resolvable:$true] %s21_s28  ;;  %s1217_s30 = int_to_ptr.vmem [resolvable:$true] %s45_s30 }
  0x26   :  { %s1033_s10 = scalar_lea.hbm %s1374_s0, 512 }
  0x27   :  { %p1034_p2 = scmp.ne.s32.totalorder %s1374_s0, %s1033_s10  ;;  %p1037_p3 = scmp.lt.u32.totalorder %s1033_s10, %s1374_s0 }
  0x29   :  { %p1039_p4 = pnand %p1037_p3, %p1034_p2 }
  0x2b   :  { %1042 = shalt.err (!%p1039_p4)
}
  0x2c   :  { %s1043_s3 = scalar_lea.vmem %s22_s28, 512  ;;  %p1048_p6 = scmp.lt.s32.totalorder %s22_s28, %s22_s28 }
  0x2d   :  { %p1044_p5 = scmp.ne.s32.totalorder %s22_s28, %s1043_s3  ;;  %p1049_p7 = scmp.lt.s32.totalorder %s1043_s3, %s1043_s3 }
  0x2f   :  { %p1050_p8 = por %p1049_p7, %p1048_p6 }
  0x31   :  { %p1051_p9 = pnand %p1050_p8, %p1044_p5 }
  0x33   :  { %1054 = shalt.err (!%p1051_p9)
}
  0x34   :  { %27 = dma.hbm_to_vmem [thread:$0]  %s1374_s0, 512, %s22_s28, [#allocation5], %s1131_s13, %s1131_s13, %s1132_s14  }
  0x35   :  { %s1055_s20 = scalar_lea.hbm %s1376_s2, 256 }
  0x36   :  { %p1056_p10 = scmp.ne.s32.totalorder %s1376_s2, %s1055_s20  ;;  %p1059_p11 = scmp.lt.u32.totalorder %s1055_s20, %s1376_s2 }
  0x38   :  { %p1061_p12 = pnand %p1059_p11, %p1056_p10 }
  0x3a   :  { %1064 = shalt.err (!%p1061_p12)
}
  0x3b   :  { %s1065_s1 = scalar_lea.vmem %s1217_s30, 256  ;;  %p1070_p0 = scmp.lt.s32.totalorder %s1217_s30, %s1217_s30 }
  0x3c   :  { %p1066_p13 = scmp.ne.s32.totalorder %s1217_s30, %s1065_s1  ;;  %p1071_p1 = scmp.lt.s32.totalorder %s1065_s1, %s1065_s1 }
  0x3e   :  { %p1072_p2 = por %p1071_p1, %p1070_p0 }
  0x40   :  { %p1073_p3 = pnand %p1072_p2, %p1066_p13 }
  0x42   :  { %1076 = shalt.err (!%p1073_p3)
}
  0x43   :  { %51 = dma.hbm_to_vmem [thread:$0]  %s1376_s2, 256, %s1217_s30, [#allocation8], %s1131_s13, %s1131_s13, %s1132_s14  }
  0x44   :  { %s1135_s26 = smov [#allocation12]   ;;  %s1077_s9 = scalar_lea.hbm %s1378_s4, 512 }
  0x45   :  { %s69_s28 = sshll.u32 %s1135_s26, 4  ;;  %p1078_p4 = scmp.ne.s32.totalorder %s1378_s4, %s1077_s9  ;;  %s70_s28 = int_to_ptr.vmem [resolvable:$true] %s69_s28 }
  0x46   :  { %p1081_p5 = scmp.lt.u32.totalorder %s1077_s9, %s1378_s4 }
  0x48   :  { %p1083_p6 = pnand %p1081_p5, %p1078_p4 }
  0x4a   :  { %1086 = shalt.err (!%p1083_p6)
}
  0x4b   :  { %s1087_s16 = scalar_lea.vmem %s70_s28, 512  ;;  %p1092_p8 = scmp.lt.s32.totalorder %s70_s28, %s70_s28 }
  0x4c   :  { %p1088_p7 = scmp.ne.s32.totalorder %s70_s28, %s1087_s16  ;;  %p1093_p9 = scmp.lt.s32.totalorder %s1087_s16, %s1087_s16 }
  0x4e   :  { %p1094_p10 = por %p1093_p9, %p1092_p8 }
  0x50   :  { %p1095_p11 = pnand %p1094_p10, %p1088_p7 }
  0x52   :  { %1098 = shalt.err (!%p1095_p11)
}
  0x53   :  { %75 = dma.hbm_to_vmem [thread:$0]  %s1378_s4, 512, %s70_s28, [#allocation11], %s1131_s13, %s1131_s13, %s1132_s14  }
  0x54   :  { %1121 = dma.done.wait [#allocation5], 512  }
  0x55   :  { %1122 = vsyncadd [#allocation5], 4294966784 }
  0x56   :  { %1123 = dma.done.wait [#allocation8], 768  }
  0x57   :  { %1124 = vsyncadd [#allocation8], 4294966528 }
  0x58   :  { %1125 = dma.done.wait [#allocation11], 1152  }
  0x59   :  { %1126 = vsyncadd [#allocation11], 4294966144  ;;  %vm99_vm0 = vcmask 130048   ;;  %v97_v0 = vld [vmem:[#allocation4] sm:$0xff]  ;;  %v98_v1 = vld [vmem:[#allocation4 + $0x8] sm:$0xff]  ;;  %vm284_vm1 = vcmask 1043456  }
  0x5a   :  { %v1269_v2 = vld [vmem:[#allocation9] sm:$0xff]  ;;  %v922_v3 = vpack.c.bf16 %v98_v1, %v97_v0  ;;  %v184_v4 = vld [vmem:[#allocation4 + $0x10] sm:$0xff]  ;;  %v185_v5 = vld [vmem:[#allocation4 + $0x18] sm:$0xff]  ;;  %vm181_vm2 = vcmask 293888   ;;  %vm495_vm3 = vcmask 261120   ;;  %s1137_s18 = smov 32  }
  0x5b   :  { %868 = vmatprep.mubr.msk.f32.mxu0 %vm99_vm0, %v1269_v2  ;;  %898 = vmatprep.mubr.msk.f32.mxu1 %vm99_vm0, %v1269_v2  ;;  %v926_v6 = vpack.c.bf16 %v185_v5, %v184_v4  ;;  %v1275_v7 = vld [vmem:[#allocation9 + $0x8] sm:$0xff]  ;;  %v267_v8 = vld [vmem:[#allocation10] sm:$0xff]  ;;  %v268_v9 = vld [vmem:[#allocation10 + $0x8] sm:$0xff]  ;;  %s1139_s19 = smov [#allocation13]  }
  0x5c   :  { %923 = vmatprep.subr.bf16.mxu0 %v922_v3  ;;  %v930_v10 = vpack.c.bf16 %v268_v9, %v267_v8  ;;  %v269_v11 = vld [vmem:[#allocation10 + $0x10] sm:$0xff]  ;;  %v270_v12 = vld [vmem:[#allocation10 + $0x18] sm:$0xff]  ;;  %v271_v14 = vld [vmem:[#allocation10 + $0x20] sm:$0xf]  ;;  %s794_s20 = sshll.u32 %s1139_s19, 4  ;;  %s795_s20 = int_to_ptr.vmem [resolvable:$true] %s794_s20 }
  0x5d   :  { %925 = vmatpush3.bf16.msra.mxu0 %v922_v3  ;;  %v934_v13 = vpack.c.bf16 %v270_v12, %v269_v11  ;;  %v817_v24 = vld [vmem:[%s1379_s5] ss:$0 sm:$0xff]  ;;  %v413_v48 = vld [vmem:[#allocation7 + $0x8] sm:$0xff]  ;;  %v415_v54 = vld [vmem:[#allocation7 + $0x18] sm:$0xff]  ;;  %s1136_s5 = smov 64   ;;  %s1099_s21 = scalar_lea.vmem %s795_s20, 512 }
  0x5e   :  { %927 = vmatprep.subr.bf16.mxu0 %v926_v6  ;;  %v412_v49 = vld [vmem:[#allocation7] sm:$0xff]  ;;  %v414_v55 = vld [vmem:[#allocation7 + $0x10] sm:$0xff]  ;;  %v579_v62 = vld [vmem:[#allocation12] sm:$0xff]  ;;  %p1100_p12 = scmp.ne.s32.totalorder %s795_s20, %s1099_s21  ;;  %p1104_p13 = scmp.lt.s32.totalorder %s795_s20, %s795_s20 }
  0x5f   :  { %v580_v63 = vld [vmem:[#allocation12 + $0x8] sm:$0xff]  ;;  %v581_v1 = vld [vmem:[#allocation12 + $0x10] sm:$0xff]  ;;  %v582_v3 = vld [vmem:[#allocation12 + $0x18] sm:$0xff]  ;;  %p1105_p0 = scmp.lt.s32.totalorder %s1099_s21, %s1099_s21 }
  0x60   :  { %869 = vmatmul.mubr.msk.f32.vlgmr.msra.gmra.mrb[0].mxu0 %vm99_vm0, %v1275_v7  ;;  %v946_v0 = vpack.c.bf16 %v580_v63, %v579_v62  ;;  %v950_v4 = vpack.c.bf16 %v582_v3, %v581_v1 }
  0x61   :  { %929 = vmatpush3.bf16.msra.mxu0 %v926_v6  ;;  %875 = vmatprep.mubr.msk.f32.mxu0 %vm99_vm0, %v1269_v2  ;;  %p1106_p1 = por %p1105_p0, %p1104_p13 }
  0x62   :  { %931 = vmatprep.subr.bf16.mxu0 %v930_v10 }
  0x63   :  { %p1107_p2 = pnand %p1106_p1, %p1100_p12 }
  0x64   :  { %876 = vmatmul.mubr.msk.f32.vlgmr.msra.gmra.mrb[2].mxu0 %vm99_vm0, %v1275_v7 }
  0x65   :  { %933 = vmatpush3.bf16.msra.mxu0 %v930_v10 }
  0x66   :  { %935 = vmatprep.subr.bf16.mxu0 %v934_v13 }
  0x69   :  { %937 = vmatpush3.bf16.msra.mxu0 %v934_v13 }
  0x6a   :  { %886 = vmatprep.subr.msk.mxu0 %vm284_vm1, %v271_v14 }
  0x6d   :  { %887 = vmatpush3.msk.msra.mxu0 %vm284_vm1, %v271_v14 }
 0x133   :  { %v870_v15 = vpop.f32.mrb[0].mxu0 }
 0x134   :  { %183 = vst.msk [vmem:[#allocation2 + $0x8] sm:$0xff] %vm181_vm2, %v870_v15  ;;  %v172_v16 = vpop.f32.mrb[1].mxu0 }
 0x135   :  { %182 = vst.msk [vmem:[#allocation2] sm:$0xff] %vm181_vm2, %v172_v16  ;;  %v830_v16 = vld [vmem:[%s1380_s6] ss:$0 sm:$0xff]  ;;  %s1138_s6 = smov 96  }
 0x137   :  { %v877_v17 = vpop.f32.mrb[2].mxu0 }
 0x138   :  { %262 = vst.msk [vmem:[#allocation2 + $0x18] sm:$0xff] %vm181_vm2, %v877_v17  ;;  %v252_v18 = vpop.f32.mrb[3].mxu0 }
 0x139   :  { %261 = vst.msk [vmem:[#allocation2 + $0x10] sm:$0xff] %vm181_vm2, %v252_v18 }
 0x13b   :  { %v264_v20 = vld [vmem:[#allocation2 + $0x8] sm:$0xff] }
 0x13c   :  { %v263_v19 = vld [vmem:[#allocation2] sm:$0xff] }
 0x13d   :  { %888 = vmatprep.mubr.msk.f32.mxu0 %vm181_vm2, %v263_v19 }
 0x13e   :  { %889 = vmatmul.mubr.msk.f32.vlgmr.msra.gmra.mrb[4].mxu0 %vm181_vm2, %v264_v20 }
 0x13f   :  { %v266_v22 = vld [vmem:[#allocation2 + $0x18] sm:$0xff] }
 0x140   :  { %v265_v21 = vld [vmem:[#allocation2 + $0x10] sm:$0xff] }
 0x141   :  { %891 = vmatprep.mubr.msk.f32.mxu0 %vm181_vm2, %v265_v21 }
 0x142   :  { %892 = vmatmul.mubr.msk.f32.gmra.mrb[6].mxu0 %vm181_vm2, %v266_v22 }
 0x211   :  { %v1291_v23 = vpop.f32.mrb[4].mxu0 }
 0x212   :  { %v374_v25 = vmax.f32 %v1291_v23, 0.0  ;;  %v1297_v26 = vpop.f32.mrb[5].mxu0 }
 0x213   :  { %v373_v27 = vmax.f32 %v1297_v26, 0.0 }
 0x214   :  { %v385_v28 = vadd.f32 %v817_v24, %v374_v25 }
 0x215   :  { %v384_v29 = vadd.f32 %v817_v24, %v373_v27  ;;  %v1300_v30 = vpop.f32.mrb[6].mxu0 }
 0x216   :  { %v819_v31 = vmul.f32 -1.442695, %v385_v28  ;;  %v376_v32 = vmax.f32 %v1300_v30, 0.0  ;;  %v1303_v33 = vpop.f32.mrb[7].mxu0 }
 0x217   :  { %v818_v34 = vmul.f32 -1.442695, %v384_v29  ;;  %v375_v35 = vmax.f32 %v1303_v33, 0.0 }
 0x218   :  { %965 = vpow2.f32 %v819_v31  ;;  %v387_v36 = vadd.f32 %v817_v24, %v376_v32 }
 0x219   :  { %967 = vpow2.f32 %v818_v34  ;;  %v386_v37 = vadd.f32 %v817_v24, %v375_v35 }
 0x21a   :  { %v821_v38 = vmul.f32 -1.442695, %v387_v36 }
 0x21b   :  { %v820_v39 = vmul.f32 -1.442695, %v386_v37 }
 0x21c   :  { %969 = vpow2.f32 %v821_v38 }
 0x21d   :  { %971 = vpow2.f32 %v820_v39 }
 0x222   :  { %v966_v40 = vpop.eup %965 }
 0x223   :  { %v968_v41 = vpop.eup %967  ;;  %v401_v42 = vadd.f32 1.0, %v966_v40 }
 0x224   :  { %v400_v43 = vadd.f32 1.0, %v968_v41 }
 0x225   :  { %973 = vrcp.f32 %v401_v42 }
 0x226   :  { %v970_v44 = vpop.eup %969  ;;  %975 = vrcp.f32 %v400_v43 }
 0x227   :  { %v972_v45 = vpop.eup %971  ;;  %v403_v46 = vadd.f32 1.0, %v970_v44 }
 0x228   :  { %v402_v47 = vadd.f32 1.0, %v972_v45 }
 0x229   :  { %977 = vrcp.f32 %v403_v46 }
 0x22a   :  { %979 = vrcp.f32 %v402_v47 }
 0x22f   :  { %v1306_v50 = vpop.eup %973 }
 0x230   :  { %v1308_v51 = vpop.eup %975  ;;  %v417_v52 = vmul.f32 %v1306_v50, %v413_v48  ;;  %v742_v43 = vsub.f32 1.0, %v1306_v50 }
 0x231   :  { %v416_v53 = vmul.f32 %v1308_v51, %v412_v49  ;;  %v741_v42 = vsub.f32 1.0, %v1308_v51 }
 0x233   :  { %v1312_v56 = vpop.eup %977  ;;  %v938_v57 = vpack.c.bf16 %v417_v52, %v416_v53 }
 0x234   :  { %v1314_v58 = vpop.eup %979  ;;  %v419_v59 = vmul.f32 %v1312_v56, %v415_v54 }
 0x235   :  { %939 = vmatprep.subr.bf16.mxu1 %v938_v57  ;;  %v418_v60 = vmul.f32 %v1314_v58, %v414_v55  ;;  %v743_v53 = vsub.f32 1.0, %v1314_v58 }
 0x236   :  { %941 = vmatpush3.bf16.msra.mxu1 %v938_v57  ;;  %v744_v57 = vsub.f32 1.0, %v1312_v56 }
 0x237   :  { %v942_v61 = vpack.c.bf16 %v419_v59, %v418_v60 }
 0x239   :  { %899 = vmatmul.mubr.msk.f32.vlgmr.msra.gmra.mrb[0].mxu1 %vm99_vm0, %v1275_v7  ;;  %943 = vmatprep.subr.bf16.mxu1 %v942_v61 }
 0x23a   :  { %945 = vmatpush3.bf16.msra.mxu1 %v942_v61  ;;  %905 = vmatprep.mubr.msk.f32.mxu1 %vm99_vm0, %v1269_v2 }
 0x23b   :  { %947 = vmatprep.subr.bf16.mxu1 %v946_v0 }
 0x23d   :  { %906 = vmatmul.mubr.msk.f32.vlgmr.msra.gmra.mrb[2].mxu1 %vm99_vm0, %v1275_v7 }
 0x23e   :  { %949 = vmatpush3.bf16.msra.mxu1 %v946_v0 }
 0x23f   :  { %951 = vmatprep.subr.bf16.mxu1 %v950_v4 }
 0x242   :  { %953 = vmatpush3.bf16.msra.mxu1 %v950_v4 }
 0x30c   :  { %v900_v5 = vpop.f32.mrb[0].mxu1 }
 0x30d   :  { %497 = vst.msk [vmem:[#allocation3 + $0x8] sm:$0xff] %vm495_vm3, %v900_v5  ;;  %v486_v6 = vpop.f32.mrb[1].mxu1 }
 0x30e   :  { %496 = vst.msk [vmem:[#allocation3] sm:$0xff] %vm495_vm3, %v486_v6 }
 0x310   :  { %v907_v2 = vpop.f32.mrb[2].mxu1 }
 0x311   :  { %574 = vst.msk [vmem:[#allocation3 + $0x18] sm:$0xff] %vm495_vm3, %v907_v2  ;;  %v564_v7 = vpop.f32.mrb[3].mxu1 }
 0x312   :  { %573 = vst.msk [vmem:[#allocation3 + $0x10] sm:$0xff] %vm495_vm3, %v564_v7 }
 0x314   :  { %v576_v9 = vld [vmem:[#allocation3 + $0x8] sm:$0xff] }
 0x315   :  { %v575_v8 = vld [vmem:[#allocation3] sm:$0xff] }
 0x316   :  { %916 = vmatprep.mubr.msk.f32.mxu1 %vm495_vm3, %v575_v8 }
 0x317   :  { %917 = vmatmul.mubr.msk.f32.vlgmr.msra.gmra.mrb[4].mxu1 %vm495_vm3, %v576_v9 }
 0x318   :  { %v578_v11 = vld [vmem:[#allocation3 + $0x18] sm:$0xff] }
 0x319   :  { %v577_v10 = vld [vmem:[#allocation3 + $0x10] sm:$0xff] }
 0x31a   :  { %919 = vmatprep.mubr.msk.f32.mxu1 %vm495_vm3, %v577_v10 }
 0x31b   :  { %920 = vmatmul.mubr.msk.f32.gmra.mrb[6].mxu1 %vm495_vm3, %v578_v11 }
 0x3ea   :  { %v918_v12 = vpop.f32.mrb[4].mxu1 }
 0x3eb   :  { %686 = vrot.lane.b32.xlu0 %v918_v12, %s1136_s5  ;;  %v661_v13 = vpop.f32.mrb[5].mxu1 }
 0x3ee   :  { %v921_v14 = vpop.f32.mrb[6].mxu1 }
 0x3ef   :  { %684 = vrot.lane.b32.xlu0 %v661_v13, %s1136_s5  ;;  %v671_v15 = vpop.f32.mrb[7].mxu1 }
 0x3f0   :  { %688 = vrot.lane.b32.xlu1 %v671_v15, %s1136_s5 }
 0x3f3   :  { %710 = vrot.lane.b32.xlu0 %v830_v16, %s1136_s5 }
 0x3f4   :  { %690 = vrot.lane.b32.xlu1 %v921_v14, %s1136_s5 }
 0x3f7   :  { %727 = vrot.lane.b32.xlu0 %v413_v48, %s1137_s18 }
 0x3f8   :  { %725 = vrot.lane.b32.xlu1 %v412_v49, %s1137_s18 }
 0x3fb   :  { %731 = vrot.lane.b32.xlu0 %v415_v54, %s1137_s18 }
 0x3fc   :  { %729 = vrot.lane.b32.xlu1 %v414_v55, %s1137_s18 }
 0x45d   :  { %v687_v17 = vpop.permute.xlu0 %686 }
 0x45e   :  { %v697_v18 = vadd.f32 %v1291_v23, %v687_v17 }
 0x460   :  { %v701_v24 = vmax.f32 %v697_v18, 0.0 }
 0x461   :  { %v685_v19 = vpop.permute.xlu0 %684 }
 0x462   :  { %v696_v20 = vadd.f32 %v685_v19, %v1297_v26  ;;  %v689_v21 = vpop.permute.xlu1 %688 }
 0x463   :  { %v698_v22 = vadd.f32 %v689_v21, %v1303_v33 }
 0x464   :  { %v700_v25 = vmax.f32 %v696_v20, 0.0 }
 0x465   :  { %v702_v27 = vmax.f32 %v698_v22, 0.0  ;;  %v711_v28 = vpop.permute.xlu0 %710 }
 0x466   :  { %v713_v29 = vadd.f32 %v711_v28, %v700_v25  ;;  %v714_v31 = vadd.f32 %v711_v28, %v701_v24  ;;  %v691_v32 = vpop.permute.xlu1 %690 }
 0x467   :  { %v699_v34 = vadd.f32 %v1300_v30, %v691_v32  ;;  %v715_v35 = vadd.f32 %v711_v28, %v702_v27 }
 0x468   :  { %981 = vtanh.f32 %v713_v29 }
 0x469   :  { %983 = vtanh.f32 %v714_v31  ;;  %v703_v36 = vmax.f32 %v699_v34, 0.0  ;;  %v728_v39 = vpop.permute.xlu0 %727 }
 0x46a   :  { %985 = vtanh.f32 %v715_v35  ;;  %v726_v30 = vpop.permute.xlu1 %725  ;;  %v738_v48 = vmul.f32 %v1306_v50, %v728_v39 }
 0x46b   :  { %v716_v23 = vadd.f32 %v711_v28, %v703_v36  ;;  %v737_v45 = vmul.f32 %v1308_v51, %v726_v30 }
 0x46d   :  { %987 = vtanh.f32 %v716_v23  ;;  %v732_v41 = vpop.permute.xlu0 %731 }
 0x46e   :  { %v730_v40 = vpop.permute.xlu1 %729  ;;  %v740_v51 = vmul.f32 %v1312_v56, %v732_v41 }
 0x46f   :  { %v739_v59 = vmul.f32 %v1314_v58, %v730_v40 }
 0x472   :  { %v982_v26 = vpop.eup %981 }
 0x473   :  { %v984_v37 = vpop.eup %983  ;;  %749 = vrot.lane.b32.xlu1 %v982_v26, %s1138_s6 }
 0x474   :  { %751 = vrot.lane.b32.xlu0 %v984_v37, %s1138_s6  ;;  %v986_v33 = vpop.eup %985 }
 0x477   :  { %v988_v38 = vpop.eup %987  ;;  %753 = vrot.lane.b32.xlu1 %v986_v33, %s1138_s6 }
 0x478   :  { %755 = vrot.lane.b32.xlu0 %v988_v38, %s1138_s6 }
 0x4e5   :  { %v750_v44 = vpop.permute.xlu1 %749 }
 0x4e6   :  { %v752_v46 = vpop.permute.xlu0 %751  ;;  %v761_v47 = vmul.f32 %v750_v44, %v741_v42 }
 0x4e7   :  { %v762_v49 = vmul.f32 %v752_v46, %v742_v43 }
 0x4e8   :  { %v765_v52 = vadd.f32 %v761_v47, %v737_v45 }
 0x4e9   :  { %v766_v54 = vadd.f32 %v762_v49, %v738_v48  ;;  %v754_v55 = vpop.permute.xlu1 %753 }
 0x4ea   :  { %v763_v60 = vmul.f32 %v754_v55, %v743_v53  ;;  %v756_v61 = vpop.permute.xlu0 %755  ;;  %773 = vrot.lane.b32.xlu1 %v765_v52, %s1138_s6 }
 0x4eb   :  { %775 = vrot.lane.b32.xlu0 %v766_v54, %s1138_s6  ;;  %v764_v62 = vmul.f32 %v756_v61, %v744_v57 }
 0x4ec   :  { %v767_v50 = vadd.f32 %v763_v60, %v739_v59 }
 0x4ed   :  { %v768_v63 = vadd.f32 %v764_v62, %v740_v51 }
 0x4ee   :  { %777 = vrot.lane.b32.xlu1 %v767_v50, %s1138_s6 }
 0x4ef   :  { %779 = vrot.lane.b32.xlu0 %v768_v63, %s1138_s6 }
 0x55c   :  { %v774_v0 = vpop.permute.xlu1 %773 }
 0x55d   :  { %v776_v1 = vpop.permute.xlu0 %775  ;;  %785 = vst.msk [vmem:[#allocation13] sm:$0xff] %vm495_vm3, %v774_v0 }
 0x55e   :  { %786 = vst.msk [vmem:[#allocation13 + $0x8] sm:$0xff] %vm495_vm3, %v776_v1 }
 0x560   :  { %v778_v58 = vpop.permute.xlu1 %777 }
 0x561   :  { %787 = vst.msk [vmem:[#allocation13 + $0x10] sm:$0xff] %vm495_vm3, %v778_v58  ;;  %v780_v56 = vpop.permute.xlu0 %779 }
 0x562   :  { %788 = vst.msk [vmem:[#allocation13 + $0x18] sm:$0xff] %vm495_vm3, %v780_v56 }
 0x563   :  { %1110 = shalt.err (!%p1107_p2)
}
 0x564   :  { %s1111_s24 = scalar_lea.hbm %s1381_s7, 512 }
 0x565   :  { %p1112_p3 = scmp.ne.s32.totalorder %s1381_s7, %s1111_s24  ;;  %p1115_p4 = scmp.lt.u32.totalorder %s1111_s24, %s1381_s7 }
 0x567   :  { %p1117_p5 = pnand %p1115_p4, %p1112_p3 }
 0x569   :  { %1120 = shalt.err (!%p1117_p5)
}
 0x56a   :  { %800 = dma.vmem_to_hbm [thread:$0]  %s795_s20, 512, %s1381_s7, [#allocation6], %s1131_s13, %s1131_s13, %s1132_s14  }
 0x56b   :  { %1127 = dma.done.wait [#allocation6], 512  }
 0x56c   :  { %1128 = vsyncadd [#allocation6], 4294966784 }
 0x56d   :  { %804 = vsyncpa [#allocation5], 1 }
 0x56e   :  { %805 = vsyncpa [#allocation8], 1 }
 0x56f   :  { %806 = vsyncpa [#allocation11], 1 }
 0x570   :  { %807 = vsyncpa [#allocation6], 1 }

// kernel: tpu_custom_call.1
= control target key start
LH: loop header
LB: loop body
LE: loop exit
PB: predicated region body
PF: predicated region fallthrough
CT: control target
= control target key end

     0   :  { %12 = vsyncpa [#allocation5], 0  ;;  %s1374_s0 = inlined_call_operand.hbm [shape: f32[32,36], index: 0, kind: input, shape index: {}]   ;;  %s1375_s1 = inlined_call_operand.hbm [shape: f32[32,32], index: 1, kind: input, shape index: {}]   ;;  %s1376_s2 = inlined_call_operand.hbm [shape: f32[16,16], index: 2, kind: input, shape index: {}]   ;;  %s1377_s3 = inlined_call_operand.hbm [shape: f32[36,96], index: 3, kind: input, shape index: {}]   ;;  %s1378_s4 = inlined_call_operand.hbm [shape: f32[32,32], index: 4, kind: input, shape index: {}]   ;;  %s1379_s5 = inlined_call_operand.vmem [shape: f32[1,64], index: 5, kind: input, shape index: {}]   ;;  %s1380_s6 = inlined_call_operand.vmem [shape: f32[1,32], index: 6, kind: input, shape index: {}]   ;;  %s1381_s7 = inlined_call_operand.hbm [shape: f32[32,32], index: 7, kind: output, shape index: {}]  }
   0x1   :  { %13 = vsyncpa [#allocation8], 0 }
   0x2   :  { %14 = vsyncpa [#allocation11], 0 }
   0x3   :  { %15 = vsyncpa [#allocation6], 0  ;;  %s1129_s24 = smov [#allocation7]   ;;  %s1130_s26 = smov [#allocation10]  }
   0x4   :  { %s33_s25 = sshll.u32 %s1129_s24, 4  ;;  %s57_s27 = sshll.u32 %s1130_s26, 4  ;;  %s34_s25 = int_to_ptr.vmem [resolvable:$true] %s33_s25  ;;  %s1180_s27 = int_to_ptr.vmem [resolvable:$true] %s57_s27 }
   0x5   :  { %s989_s30 = scalar_lea.hbm %s1375_s1, 512 }
   0x6   :  { %p990_p0 = scmp.ne.s32.totalorder %s1375_s1, %s989_s30  ;;  %p993_p1 = scmp.lt.u32.totalorder %s989_s30, %s1375_s1 }
   0x8   :  { %p995_p2 = pnand %p993_p1, %p990_p0 }
   0xa   :  { %998 = shalt.err (!%p995_p2)
}
   0xb   :  { %s999_s12 = scalar_lea.vmem %s34_s25, 512  ;;  %p1004_p4 = scmp.lt.s32.totalorder %s34_s25, %s34_s25 }
   0xc   :  { %p1000_p3 = scmp.ne.s32.totalorder %s34_s25, %s999_s12  ;;  %p1005_p5 = scmp.lt.s32.totalorder %s999_s12, %s999_s12 }
   0xe   :  { %p1006_p6 = por %p1005_p5, %p1004_p4 }
  0x10   :  { %p1007_p7 = pnand %p1006_p6, %p1000_p3 }
  0x12   :  { %1010 = shalt.err (!%p1007_p7)
}
  0x13   :  { %s1131_s13 = smov 128   ;;  %s1132_s14 = smov 8  }
  0x14   :  { %39 = dma.hbm_to_vmem [thread:$0]  %s1375_s1, 512, %s34_s25, [#allocation8], %s1131_s13, %s1131_s13, %s1132_s14  }
  0x15   :  { %s1011_s19 = scalar_lea.hbm %s1377_s3, 640 }
  0x16   :  { %p1012_p8 = scmp.ne.s32.totalorder %s1377_s3, %s1011_s19  ;;  %p1015_p9 = scmp.lt.u32.totalorder %s1011_s19, %s1377_s3 }
  0x18   :  { %p1017_p10 = pnand %p1015_p9, %p1012_p8 }
  0x1a   :  { %1020 = shalt.err (!%p1017_p10)
}
  0x1b   :  { %s1021_s24 = scalar_lea.vmem %s1180_s27, 640  ;;  %p1026_p12 = scmp.lt.s32.totalorder %s1180_s27, %s1180_s27 }
  0x1c   :  { %p1022_p11 = scmp.ne.s32.totalorder %s1180_s27, %s1021_s24  ;;  %p1027_p13 = scmp.lt.s32.totalorder %s1021_s24, %s1021_s24 }
  0x1e   :  { %p1028_p0 = por %p1027_p13, %p1026_p12 }
  0x20   :  { %p1029_p1 = pnand %p1028_p0, %p1022_p11 }
  0x22   :  { %1032 = shalt.err (!%p1029_p1)
}
  0x23   :  { %63 = dma.hbm_to_vmem [thread:$0]  %s1377_s3, 640, %s1180_s27, [#allocation11], %s1131_s13, %s1131_s13, %s1132_s14  }
  0x24   :  { %s1133_s26 = smov [#allocation4]   ;;  %s1134_s29 = smov [#allocation9]  }
  0x25   :  { %s21_s28 = sshll.u32 %s1133_s26, 4  ;;  %s45_s30 = sshll.u32 %s1134_s29, 4  ;;  %s22_s28 = int_to_ptr.vmem [resolvable:$true] %s21_s28  ;;  %s1217_s30 = int_to_ptr.vmem [resolvable:$true] %s45_s30 }
  0x26   :  { %s1033_s10 = scalar_lea.hbm %s1374_s0, 512 }
  0x27   :  { %p1034_p2 = scmp.ne.s32.totalorder %s1374_s0, %s1033_s10  ;;  %p1037_p3 = scmp.lt.u32.totalorder %s1033_s10, %s1374_s0 }
  0x29   :  { %p1039_p4 = pnand %p1037_p3, %p1034_p2 }
  0x2b   :  { %1042 = shalt.err (!%p1039_p4)
}
  0x2c   :  { %s1043_s3 = scalar_lea.vmem %s22_s28, 512  ;;  %p1048_p6 = scmp.lt.s32.totalorder %s22_s28, %s22_s28 }
  0x2d   :  { %p1044_p5 = scmp.ne.s32.totalorder %s22_s28, %s1043_s3  ;;  %p1049_p7 = scmp.lt.s32.totalorder %s1043_s3, %s1043_s3 }
  0x2f   :  { %p1050_p8 = por %p1049_p7, %p1048_p6 }
  0x31   :  { %p1051_p9 = pnand %p1050_p8, %p1044_p5 }
  0x33   :  { %1054 = shalt.err (!%p1051_p9)
}
  0x34   :  { %27 = dma.hbm_to_vmem [thread:$0]  %s1374_s0, 512, %s22_s28, [#allocation5], %s1131_s13, %s1131_s13, %s1132_s14  }
  0x35   :  { %s1055_s20 = scalar_lea.hbm %s1376_s2, 256 }
  0x36   :  { %p1056_p10 = scmp.ne.s32.totalorder %s1376_s2, %s1055_s20  ;;  %p1059_p11 = scmp.lt.u32.totalorder %s1055_s20, %s1376_s2 }
  0x38   :  { %p1061_p12 = pnand %p1059_p11, %p1056_p10 }
  0x3a   :  { %1064 = shalt.err (!%p1061_p12)
}
  0x3b   :  { %s1065_s1 = scalar_lea.vmem %s1217_s30, 256  ;;  %p1070_p0 = scmp.lt.s32.totalorder %s1217_s30, %s1217_s30 }
  0x3c   :  { %p1066_p13 = scmp.ne.s32.totalorder %s1217_s30, %s1065_s1  ;;  %p1071_p1 = scmp.lt.s32.totalorder %s1065_s1, %s1065_s1 }
  0x3e   :  { %p1072_p2 = por %p1071_p1, %p1070_p0 }
  0x40   :  { %p1073_p3 = pnand %p1072_p2, %p1066_p13 }
  0x42   :  { %1076 = shalt.err (!%p1073_p3)
}
  0x43   :  { %51 = dma.hbm_to_vmem [thread:$0]  %s1376_s2, 256, %s1217_s30, [#allocation8], %s1131_s13, %s1131_s13, %s1132_s14  }
  0x44   :  { %s1135_s26 = smov [#allocation12]   ;;  %s1077_s9 = scalar_lea.hbm %s1378_s4, 512 }
  0x45   :  { %s69_s28 = sshll.u32 %s1135_s26, 4  ;;  %p1078_p4 = scmp.ne.s32.totalorder %s1378_s4, %s1077_s9  ;;  %s70_s28 = int_to_ptr.vmem [resolvable:$true] %s69_s28 }
  0x46   :  { %p1081_p5 = scmp.lt.u32.totalorder %s1077_s9, %s1378_s4 }
  0x48   :  { %p1083_p6 = pnand %p1081_p5, %p1078_p4 }
  0x4a   :  { %1086 = shalt.err (!%p1083_p6)
}
  0x4b   :  { %s1087_s16 = scalar_lea.vmem %s70_s28, 512  ;;  %p1092_p8 = scmp.lt.s32.totalorder %s70_s28, %s70_s28 }
  0x4c   :  { %p1088_p7 = scmp.ne.s32.totalorder %s70_s28, %s1087_s16  ;;  %p1093_p9 = scmp.lt.s32.totalorder %s1087_s16, %s1087_s16 }
  0x4e   :  { %p1094_p10 = por %p1093_p9, %p1092_p8 }
  0x50   :  { %p1095_p11 = pnand %p1094_p10, %p1088_p7 }
  0x52   :  { %1098 = shalt.err (!%p1095_p11)
}
  0x53   :  { %75 = dma.hbm_to_vmem [thread:$0]  %s1378_s4, 512, %s70_s28, [#allocation11], %s1131_s13, %s1131_s13, %s1132_s14  }
  0x54   :  { %1121 = dma.done.wait [#allocation5], 512  }
  0x55   :  { %1122 = vsyncadd [#allocation5], 4294966784 }
  0x56   :  { %1123 = dma.done.wait [#allocation8], 768  }
  0x57   :  { %1124 = vsyncadd [#allocation8], 4294966528 }
  0x58   :  { %1125 = dma.done.wait [#allocation11], 1152  }
  0x59   :  { %1126 = vsyncadd [#allocation11], 4294966144  ;;  %vm99_vm0 = vcmask 130048   ;;  %v97_v0 = vld [vmem:[#allocation4] sm:$0xff]  ;;  %v98_v1 = vld [vmem:[#allocation4 + $0x8] sm:$0xff]  ;;  %vm284_vm1 = vcmask 1043456  }
  0x5a   :  { %v1269_v2 = vld [vmem:[#allocation9] sm:$0xff]  ;;  %v922_v3 = vpack.c.bf16 %v98_v1, %v97_v0  ;;  %v184_v4 = vld [vmem:[#allocation4 + $0x10] sm:$0xff]  ;;  %v185_v5 = vld [vmem:[#allocation4 + $0x18] sm:$0xff]  ;;  %vm181_vm2 = vcmask 293888   ;;  %vm495_vm3 = vcmask 261120   ;;  %s1137_s18 = smov 32  }
  0x5b   :  { %868 = vmatprep.mubr.msk.f32.mxu0 %vm99_vm0, %v1269_v2  ;;  %898 = vmatprep.mubr.msk.f32.mxu1 %vm99_vm0, %v1269_v2  ;;  %v926_v6 = vpack.c.bf16 %v185_v5, %v184_v4  ;;  %v1275_v7 = vld [vmem:[#allocation9 + $0x8] sm:$0xff]  ;;  %v267_v8 = vld [vmem:[#allocation10] sm:$0xff]  ;;  %v268_v9 = vld [vmem:[#allocation10 + $0x8] sm:$0xff]  ;;  %s1139_s19 = smov [#allocation13]  }
  0x5c   :  { %923 = vmatprep.subr.bf16.mxu0 %v922_v3  ;;  %v930_v10 = vpack.c.bf16 %v268_v9, %v267_v8  ;;  %v269_v11 = vld [vmem:[#allocation10 + $0x10] sm:$0xff]  ;;  %v270_v12 = vld [vmem:[#allocation10 + $0x18] sm:$0xff]  ;;  %v271_v14 = vld [vmem:[#allocation10 + $0x20] sm:$0xf]  ;;  %s794_s20 = sshll.u32 %s1139_s19, 4  ;;  %s795_s20 = int_to_ptr.vmem [resolvable:$true] %s794_s20 }
  0x5d   :  { %925 = vmatpush3.bf16.msra.mxu0 %v922_v3  ;;  %v934_v13 = vpack.c.bf16 %v270_v12, %v269_v11  ;;  %v817_v24 = vld [vmem:[%s1379_s5] ss:$0 sm:$0xff]  ;;  %v413_v48 = vld [vmem:[#allocation7 + $0x8] sm:$0xff]  ;;  %v415_v54 = vld [vmem:[#allocation7 + $0x18] sm:$0xff]  ;;  %s1136_s5 = smov 64   ;;  %s1099_s21 = scalar_lea.vmem %s795_s20, 512 }
  0x5e   :  { %927 = vmatprep.subr.bf16.mxu0 %v926_v6  ;;  %v412_v49 = vld [vmem:[#allocation7] sm:$0xff]  ;;  %v414_v55 = vld [vmem:[#allocation7 + $0x10] sm:$0xff]  ;;  %v579_v62 = vld [vmem:[#allocation12] sm:$0xff]  ;;  %p1100_p12 = scmp.ne.s32.totalorder %s795_s20, %s1099_s21  ;;  %p1104_p13 = scmp.lt.s32.totalorder %s795_s20, %s795_s20 }
  0x5f   :  { %v580_v63 = vld [vmem:[#allocation12 + $0x8] sm:$0xff]  ;;  %v581_v1 = vld [vmem:[#allocation12 + $0x10] sm:$0xff]  ;;  %v582_v3 = vld [vmem:[#allocation12 + $0x18] sm:$0xff]  ;;  %p1105_p0 = scmp.lt.s32.totalorder %s1099_s21, %s1099_s21 }
  0x60   :  { %869 = vmatmul.mubr.msk.f32.vlgmr.msra.gmra.mrb[0].mxu0 %vm99_vm0, %v1275_v7  ;;  %v946_v0 = vpack.c.bf16 %v580_v63, %v579_v62  ;;  %v950_v4 = vpack.c.bf16 %v582_v3, %v581_v1 }
  0x61   :  { %929 = vmatpush3.bf16.msra.mxu0 %v926_v6  ;;  %875 = vmatprep.mubr.msk.f32.mxu0 %vm99_vm0, %v1269_v2  ;;  %p1106_p1 = por %p1105_p0, %p1104_p13 }
  0x62   :  { %931 = vmatprep.subr.bf16.mxu0 %v930_v10 }
  0x63   :  { %p1107_p2 = pnand %p1106_p1, %p1100_p12 }
  0x64   :  { %876 = vmatmul.mubr.msk.f32.vlgmr.msra.gmra.mrb[2].mxu0 %vm99_vm0, %v1275_v7 }
  0x65   :  { %933 = vmatpush3.bf16.msra.mxu0 %v930_v10 }
  0x66   :  { %935 = vmatprep.subr.bf16.mxu0 %v934_v13 }
  0x69   :  { %937 = vmatpush3.bf16.msra.mxu0 %v934_v13 }
  0x6a   :  { %886 = vmatprep.subr.msk.mxu0 %vm284_vm1, %v271_v14 }
  0x6d   :  { %887 = vmatpush3.msk.msra.mxu0 %vm284_vm1, %v271_v14 }
 0x133   :  { %v870_v15 = vpop.f32.mrb[0].mxu0 }
 0x134   :  { %183 = vst.msk [vmem:[#allocation2 + $0x8] sm:$0xff] %vm181_vm2, %v870_v15  ;;  %v172_v16 = vpop.f32.mrb[1].mxu0 }
 0x135   :  { %182 = vst.msk [vmem:[#allocation2] sm:$0xff] %vm181_vm2, %v172_v16  ;;  %v830_v16 = vld [vmem:[%s1380_s6] ss:$0 sm:$0xff]  ;;  %s1138_s6 = smov 96  }
 0x137   :  { %v877_v17 = vpop.f32.mrb[2].mxu0 }
 0x138   :  { %262 = vst.msk [vmem:[#allocation2 + $0x18] sm:$0xff] %vm181_vm2, %v877_v17  ;;  %v252_v18 = vpop.f32.mrb[3].mxu0 }
 0x139   :  { %261 = vst.msk [vmem:[#allocation2 + $0x10] sm:$0xff] %vm181_vm2, %v252_v18 }
 0x13b   :  { %v264_v20 = vld [vmem:[#allocation2 + $0x8] sm:$0xff] }
 0x13c   :  { %v263_v19 = vld [vmem:[#allocation2] sm:$0xff] }
 0x13d   :  { %888 = vmatprep.mubr.msk.f32.mxu0 %vm181_vm2, %v263_v19 }
 0x13e   :  { %889 = vmatmul.mubr.msk.f32.vlgmr.msra.gmra.mrb[4].mxu0 %vm181_vm2, %v264_v20 }
 0x13f   :  { %v266_v22 = vld [vmem:[#allocation2 + $0x18] sm:$0xff] }
 0x140   :  { %v265_v21 = vld [vmem:[#allocation2 + $0x10] sm:$0xff] }
 0x141   :  { %891 = vmatprep.mubr.msk.f32.mxu0 %vm181_vm2, %v265_v21 }
 0x142   :  { %892 = vmatmul.mubr.msk.f32.gmra.mrb[6].mxu0 %vm181_vm2, %v266_v22 }
 0x211   :  { %v1291_v23 = vpop.f32.mrb[4].mxu0 }
 0x212   :  { %v374_v25 = vmax.f32 %v1291_v23, 0.0  ;;  %v1297_v26 = vpop.f32.mrb[5].mxu0 }
 0x213   :  { %v373_v27 = vmax.f32 %v1297_v26, 0.0 }
 0x214   :  { %v385_v28 = vadd.f32 %v817_v24, %v374_v25 }
 0x215   :  { %v384_v29 = vadd.f32 %v817_v24, %v373_v27  ;;  %v1300_v30 = vpop.f32.mrb[6].mxu0 }
 0x216   :  { %v819_v31 = vmul.f32 -1.442695, %v385_v28  ;;  %v376_v32 = vmax.f32 %v1300_v30, 0.0  ;;  %v1303_v33 = vpop.f32.mrb[7].mxu0 }
 0x217   :  { %v818_v34 = vmul.f32 -1.442695, %v384_v29  ;;  %v375_v35 = vmax.f32 %v1303_v33, 0.0 }
 0x218   :  { %965 = vpow2.f32 %v819_v31  ;;  %v387_v36 = vadd.f32 %v817_v24, %v376_v32 }
 0x219   :  { %967 = vpow2.f32 %v818_v34  ;;  %v386_v37 = vadd.f32 %v817_v24, %v375_v35 }
 0x21a   :  { %v821_v38 = vmul.f32 -1.442695, %v387_v36 }
 0x21b   :  { %v820_v39 = vmul.f32 -1.442695, %v386_v37 }
 0x21c   :  { %969 = vpow2.f32 %v821_v38 }
 0x21d   :  { %971 = vpow2.f32 %v820_v39 }
 0x222   :  { %v966_v40 = vpop.eup %965 }
 0x223   :  { %v968_v41 = vpop.eup %967  ;;  %v401_v42 = vadd.f32 1.0, %v966_v40 }
 0x224   :  { %v400_v43 = vadd.f32 1.0, %v968_v41 }
 0x225   :  { %973 = vrcp.f32 %v401_v42 }
 0x226   :  { %v970_v44 = vpop.eup %969  ;;  %975 = vrcp.f32 %v400_v43 }
 0x227   :  { %v972_v45 = vpop.eup %971  ;;  %v403_v46 = vadd.f32 1.0, %v970_v44 }
 0x228   :  { %v402_v47 = vadd.f32 1.0, %v972_v45 }
 0x229   :  { %977 = vrcp.f32 %v403_v46 }
 0x22a   :  { %979 = vrcp.f32 %v402_v47 }
 0x22f   :  { %v1306_v50 = vpop.eup %973 }
 0x230   :  { %v1308_v51 = vpop.eup %975  ;;  %v417_v52 = vmul.f32 %v1306_v50, %v413_v48  ;;  %v742_v43 = vsub.f32 1.0, %v1306_v50 }
 0x231   :  { %v416_v53 = vmul.f32 %v1308_v51, %v412_v49  ;;  %v741_v42 = vsub.f32 1.0, %v1308_v51 }
 0x233   :  { %v1312_v56 = vpop.eup %977  ;;  %v938_v57 = vpack.c.bf16 %v417_v52, %v416_v53 }
 0x234   :  { %v1314_v58 = vpop.eup %979  ;;  %v419_v59 = vmul.f32 %v1312_v56, %v415_v54 }
 0x235   :  { %939 = vmatprep.subr.bf16.mxu1 %v938_v57  ;;  %v418_v60 = vmul.f32 %v1314_v58, %v414_v55  ;;  %v743_v53 = vsub.f32 1.0, %v1314_v58 }
 0x236   :  { %941 = vmatpush3.bf16.msra.mxu1 %v938_v57  ;;  %v744_v57 = vsub.f32 1.0, %v1312_v56 }
 0x237   :  { %v942_v61 = vpack.c.bf16 %v419_v59, %v418_v60 }
 0x239   :  { %899 = vmatmul.mubr.msk.f32.vlgmr.msra.gmra.mrb[0].mxu1 %vm99_vm0, %v1275_v7  ;;  %943 = vmatprep.subr.bf16.mxu1 %v942_v61 }
 0x23a   :  { %945 = vmatpush3.bf16.msra.mxu1 %v942_v61  ;;  %905 = vmatprep.mubr.msk.f32.mxu1 %vm99_vm0, %v1269_v2 }
 0x23b   :  { %947 = vmatprep.subr.bf16.mxu1 %v946_v0 }
 0x23d   :  { %906 = vmatmul.mubr.msk.f32.vlgmr.msra.gmra.mrb[2].mxu1 %vm99_vm0, %v1275_v7 }
 0x23e   :  { %949 = vmatpush3.bf16.msra.mxu1 %v946_v0 }
 0x23f   :  { %951 = vmatprep.subr.bf16.mxu1 %v950_v4 }
 0x242   :  { %953 = vmatpush3.bf16.msra.mxu1 %v950_v4 }
 0x30c   :  { %v900_v5 = vpop.f32.mrb[0].mxu1 }
 0x30d   :  { %497 = vst.msk [vmem:[#allocation3 + $0x8] sm:$0xff] %vm495_vm3, %v900_v5  ;;  %v486_v6 = vpop.f32.mrb[1].mxu1 }
 0x30e   :  { %496 = vst.msk [vmem:[#allocation3] sm:$0xff] %vm495_vm3, %v486_v6 }
 0x310   :  { %v907_v2 = vpop.f32.mrb[2].mxu1 }
 0x311   :  { %574 = vst.msk [vmem:[#allocation3 + $0x18] sm:$0xff] %vm495_vm3, %v907_v2  ;;  %v564_v7 = vpop.f32.mrb[3].mxu1 }
 0x312   :  { %573 = vst.msk [vmem:[#allocation3 + $0x10] sm:$0xff] %vm495_vm3, %v564_v7 }
 0x314   :  { %v576_v9 = vld [vmem:[#allocation3 + $0x8] sm:$0xff] }
 0x315   :  { %v575_v8 = vld [vmem:[#allocation3] sm:$0xff] }
 0x316   :  { %916 = vmatprep.mubr.msk.f32.mxu1 %vm495_vm3, %v575_v8 }
 0x317   :  { %917 = vmatmul.mubr.msk.f32.vlgmr.msra.gmra.mrb[4].mxu1 %vm495_vm3, %v576_v9 }
 0x318   :  { %v578_v11 = vld [vmem:[#allocation3 + $0x18] sm:$0xff] }
 0x319   :  { %v577_v10 = vld [vmem:[#allocation3 + $0x10] sm:$0xff] }
 0x31a   :  { %919 = vmatprep.mubr.msk.f32.mxu1 %vm495_vm3, %v577_v10 }
 0x31b   :  { %920 = vmatmul.mubr.msk.f32.gmra.mrb[6].mxu1 %vm495_vm3, %v578_v11 }
 0x3ea   :  { %v918_v12 = vpop.f32.mrb[4].mxu1 }
 0x3eb   :  { %686 = vrot.lane.b32.xlu0 %v918_v12, %s1136_s5  ;;  %v661_v13 = vpop.f32.mrb[5].mxu1 }
 0x3ee   :  { %v921_v14 = vpop.f32.mrb[6].mxu1 }
 0x3ef   :  { %684 = vrot.lane.b32.xlu0 %v661_v13, %s1136_s5  ;;  %v671_v15 = vpop.f32.mrb[7].mxu1 }
 0x3f0   :  { %688 = vrot.lane.b32.xlu1 %v671_v15, %s1136_s5 }
 0x3f3   :  { %710 = vrot.lane.b32.xlu0 %v830_v16, %s1136_s5 }
 0x3f4   :  { %690 = vrot.lane.b32.xlu1 %v921_v14, %s1136_s5 }
 0x3f7   :  { %727 = vrot.lane.b32.xlu0 %v413_v48, %s1137_s18 }
 0x3f8   :  { %725 = vrot.lane.b32.xlu1 %v412_v49, %s1137_s18 }
 0x3fb   :  { %731 = vrot.lane.b32.xlu0 %v415_v54, %s1137_s18 }
 0x3fc   :  { %729 = vrot.lane.b32.xlu1 %v414_v55, %s1137_s18 }
 0x45d   :  { %v687_v17 = vpop.permute.xlu0 %686 }
 0x45e   :  { %v697_v18 = vadd.f32 %v1291_v23, %v687_v17 }
 0x460   :  { %v701_v24 = vmax.f32 %v697_v18, 0.0 }
 0x461   :  { %v685_v19 = vpop.permute.xlu0 %684 }
 0x462   :  { %v696_v20 = vadd.f32 %v685_v19, %v1297_v26  ;;  %v689_v21 = vpop.permute.xlu1 %688 }
 0x463   :  { %v698_v22 = vadd.f32 %v689_v21, %v1303_v33 }
 0x464   :  { %v700_v25 = vmax.f32 %v696_v20, 0.0 }
 0x465   :  { %v702_v27 = vmax.f32 %v698_v22, 0.0  ;;  %v711_v28 = vpop.permute.xlu0 %710 }
 0x466   :  { %v713_v29 = vadd.f32 %v711_v28, %v700_v25  ;;  %v714_v31 = vadd.f32 %v711_v28, %v701_v24  ;;  %v691_v32 = vpop.permute.xlu1 %690 }
 0x467   :  { %v699_v34 = vadd.f32 %v1300_v30, %v691_v32  ;;  %v715_v35 = vadd.f32 %v711_v28, %v702_v27 }
 0x468   :  { %981 = vtanh.f32 %v713_v29 }
 0x469   :  { %983 = vtanh.f32 %v714_v31  ;;  %v703_v36 = vmax.f32 %v699_v34, 0.0  ;;  %v728_v39 = vpop.permute.xlu0 %727 }
 0x46a   :  { %985 = vtanh.f32 %v715_v35  ;;  %v726_v30 = vpop.permute.xlu1 %725  ;;  %v738_v48 = vmul.f32 %v1306_v50, %v728_v39 }
 0x46b   :  { %v716_v23 = vadd.f32 %v711_v28, %v703_v36  ;;  %v737_v45 = vmul.f32 %v1308_v51, %v726_v30 }
 0x46d   :  { %987 = vtanh.f32 %v716_v23  ;;  %v732_v41 = vpop.permute.xlu0 %731 }
 0x46e   :  { %v730_v40 = vpop.permute.xlu1 %729  ;;  %v740_v51 = vmul.f32 %v1312_v56, %v732_v41 }
 0x46f   :  { %v739_v59 = vmul.f32 %v1314_v58, %v730_v40 }
 0x472   :  { %v982_v26 = vpop.eup %981 }
 0x473   :  { %v984_v37 = vpop.eup %983  ;;  %749 = vrot.lane.b32.xlu1 %v982_v26, %s1138_s6 }
 0x474   :  { %751 = vrot.lane.b32.xlu0 %v984_v37, %s1138_s6  ;;  %v986_v33 = vpop.eup %985 }
 0x477   :  { %v988_v38 = vpop.eup %987  ;;  %753 = vrot.lane.b32.xlu1 %v986_v33, %s1138_s6 }
 0x478   :  { %755 = vrot.lane.b32.xlu0 %v988_v38, %s1138_s6 }
 0x4e5   :  { %v750_v44 = vpop.permute.xlu1 %749 }
 0x4e6   :  { %v752_v46 = vpop.permute.xlu0 %751  ;;  %v761_v47 = vmul.f32 %v750_v44, %v741_v42 }
 0x4e7   :  { %v762_v49 = vmul.f32 %v752_v46, %v742_v43 }
 0x4e8   :  { %v765_v52 = vadd.f32 %v761_v47, %v737_v45 }
 0x4e9   :  { %v766_v54 = vadd.f32 %v762_v49, %v738_v48  ;;  %v754_v55 = vpop.permute.xlu1 %753 }
 0x4ea   :  { %v763_v60 = vmul.f32 %v754_v55, %v743_v53  ;;  %v756_v61 = vpop.permute.xlu0 %755  ;;  %773 = vrot.lane.b32.xlu1 %v765_v52, %s1138_s6 }
 0x4eb   :  { %775 = vrot.lane.b32.xlu0 %v766_v54, %s1138_s6  ;;  %v764_v62 = vmul.f32 %v756_v61, %v744_v57 }
 0x4ec   :  { %v767_v50 = vadd.f32 %v763_v60, %v739_v59 }
 0x4ed   :  { %v768_v63 = vadd.f32 %v764_v62, %v740_v51 }
 0x4ee   :  { %777 = vrot.lane.b32.xlu1 %v767_v50, %s1138_s6 }
 0x4ef   :  { %779 = vrot.lane.b32.xlu0 %v768_v63, %s1138_s6 }
 0x55c   :  { %v774_v0 = vpop.permute.xlu1 %773 }
 0x55d   :  { %v776_v1 = vpop.permute.xlu0 %775  ;;  %785 = vst.msk [vmem:[#allocation13] sm:$0xff] %vm495_vm3, %v774_v0 }
 0x55e   :  { %786 = vst.msk [vmem:[#allocation13 + $0x8] sm:$0xff] %vm495_vm3, %v776_v1 }
 0x560   :  { %v778_v58 = vpop.permute.xlu1 %777 }
 0x561   :  { %787 = vst.msk [vmem:[#allocation13 + $0x10] sm:$0xff] %vm495_vm3, %v778_v58  ;;  %v780_v56 = vpop.permute.xlu0 %779 }
 0x562   :  { %788 = vst.msk [vmem:[#allocation13 + $0x18] sm:$0xff] %vm495_vm3, %v780_v56 }
 0x563   :  { %1110 = shalt.err (!%p1107_p2)
}
 0x564   :  { %s1111_s24 = scalar_lea.hbm %s1381_s7, 512 }
 0x565   :  { %p1112_p3 = scmp.ne.s32.totalorder %s1381_s7, %s1111_s24  ;;  %p1115_p4 = scmp.lt.u32.totalorder %s1111_s24, %s1381_s7 }
 0x567   :  { %p1117_p5 = pnand %p1115_p4, %p1112_p3 }
 0x569   :  { %1120 = shalt.err (!%p1117_p5)
}
 0x56a   :  { %800 = dma.vmem_to_hbm [thread:$0]  %s795_s20, 512, %s1381_s7, [#allocation6], %s1131_s13, %s1131_s13, %s1132_s14  }
 0x56b   :  { %1127 = dma.done.wait [#allocation6], 512  }
 0x56c   :  { %1128 = vsyncadd [#allocation6], 4294966784 }
 0x56d   :  { %804 = vsyncpa [#allocation5], 1 }
 0x56e   :  { %805 = vsyncpa [#allocation8], 1 }
 0x56f   :  { %806 = vsyncpa [#allocation11], 1 }
 0x570   :  { %807 = vsyncpa [#allocation6], 1 }

</bundles_post_ra>
